<compile_context>
chip_gen: v5e
topology: v5e:2x2
jax: 0.10.0
libtpu: 0.0.40
codegen_flags: <defaults>
</compile_context>

<pallas_src>
import functools

import jax
import jax.numpy as jnp
from jax import lax
from jax.experimental import pallas as pl
from jax.experimental.pallas import tpu as pltpu

_LANES = 128
_SUBLANES = 8


def _round_up(x, m):
    return -(-x // m) * m


def _default_num_partials():
    """2 partial sums (one per TensorCore) on v7x, 1 on single-TC chips."""
    try:
        kind = jax.devices()[0].device_kind.lower()
    except Exception:  # pragma: no cover - defensive
        return 1
    return 2 if ("v7" in kind or "tpu7" in kind) else 1


def _mse_partial_kernel(pred_ref, target_ref, out_ref, acc_ref, *,
                        blocks_per_partial, tile_rows, acc_rows,
                        valid_rows, needs_mask):
    c = pl.program_id(0)   # partial-sum ("core") axis   -- parallel
    i = pl.program_id(1)   # row-block axis              -- reduction

    @pl.when(i == 0)
    def _init():
        acc_ref[...] = jnp.zeros_like(acc_ref)

    diff = pred_ref[...].astype(jnp.float32) - target_ref[...].astype(jnp.float32)

    def _fold(d):
        sq = d * d
        # Fold (tile_rows, 128) into the (acc_rows, 128) accumulator:
        # acc_rows independent add chains feed the 4 VALU slots and stay
        # hidden under the input DMA.
        acc_ref[...] += sq.reshape(tile_rows // acc_rows, acc_rows,
                                   _LANES).sum(axis=0)

    if needs_mask:
        # Global (unclamped) first-row id of this tile.  Only blocks that
        # actually over-cover the valid range (the partial last block and any
        # duplicated clamped block) pay the iota/compare/select cost.
        row0 = (c * blocks_per_partial + i) * tile_rows
        overcovers = row0 + tile_rows > valid_rows

        @pl.when(jnp.logical_not(overcovers))
        def _clean():
            _fold(diff)

        @pl.when(overcovers)
        def _masked():
            # Mask BEFORE squaring: garbage (possibly Inf/NaN) rows are
            # discarded by the select, never multiplied.
            rid = row0 + lax.broadcasted_iota(jnp.int32, diff.shape, 0)
            _fold(jnp.where(rid < valid_rows, diff, jnp.float32(0.0)))
    else:
        _fold(diff)

    @pl.when(i == pl.num_programs(1) - 1)
    def _finalize():
        # Lane-dense (acc_rows,128) store; the tiny final reduce happens in
        # the wrapper.
        out_ref[0, :, :] = acc_ref[...]


def sigmoid_mae_loss(pred, target, *, tile_rows=8192, num_partials=None):
    """Forward of SigmoidMAELoss (== MSELoss): mean((pred - target)^2) -> f32."""
    assert pred.shape == target.shape, "pred/target must have identical shapes"
    total_elems = pred.size
    if num_partials is None:
        num_partials = _default_num_partials()

    p_flat = pred.reshape(-1)       # metadata-only, native dtype
    t_flat = target.reshape(-1)

    # --- split off the ragged (<128 element) tail: tiny plain-JAX reduction,
    # --- no full-array pad copy. Main path stays zero-copy. -----------------
    main = (total_elems // _LANES) * _LANES
    tail_sum = jnp.float32(0.0)
    if main != total_elems:
        pt = p_flat[main:].astype(jnp.float32)
        tt = t_flat[main:].astype(jnp.float32)
        tail_sum = jnp.sum((pt - tt) ** 2)
        p_flat = p_flat[:main]
        t_flat = t_flat[:main]

    if main == 0:
        return tail_sum / jnp.float32(total_elems)

    rows = main // _LANES
    p2d = p_flat.reshape(rows, _LANES)
    t2d = t_flat.reshape(rows, _LANES)

    # --- tiling --------------------------------------------------------------
    # Row tile: large for bandwidth, multiple of 8 for the (8,128) constraint.
    tile = min(tile_rows, _round_up(rows, _SUBLANES))
    tile = _round_up(tile, _SUBLANES)
    n_blocks = -(-rows // tile)
    num_partials = max(1, min(num_partials, n_blocks))
    bpp = -(-n_blocks // num_partials)        # row-blocks per partial sum
    # Masking only needed if the grid over-covers the array (partial last tile
    # or duplicated clamped blocks); skipped statically otherwise.
    needs_mask = (num_partials * bpp != n_blocks) or (n_blocks * tile != rows)

    # Widened accumulator (up to 64 sublanes) to break the fold's dep chain.
    acc_rows = next(r for r in (64, 32, 16, 8) if tile % r == 0)

    kernel = functools.partial(
        _mse_partial_kernel,
        blocks_per_partial=bpp,
        tile_rows=tile,
        acc_rows=acc_rows,
        valid_rows=rows,
        needs_mask=needs_mask,
    )

    def in_map(c, i):
        # Clamp so the DMA never starts past the array end; duplicated blocks
        # are zeroed by the in-kernel mask.
        return (jnp.minimum(c * bpp + i, n_blocks - 1), 0)

    # VMEM budget: 2 inputs x 2 buffers x block, plus headroom for output /
    # scratch / internal scratch.  Raised above v5e's 16 MiB default; capped
    # comfortably under v7x's 64 MiB physical VMEM.
    itemsize = jnp.dtype(pred.dtype).itemsize
    in_block_bytes = tile * _LANES * itemsize
    vmem_limit = int(min(max(4 * in_block_bytes + (8 << 20), 16 << 20),
                         48 << 20))

    # Scheduler hint: pure bandwidth sink.
    cost = pl.CostEstimate(
        flops=3 * total_elems,
        transcendentals=0,
        bytes_accessed=2 * total_elems * itemsize
        + num_partials * acc_rows * _LANES * 4,
    )

    if num_partials > 1 and hasattr(pltpu, "CORE_PARALLEL"):
        # v7x: actually shard the leading axis across the 2 TensorCores.
        dim_sem = (pltpu.CORE_PARALLEL, pltpu.ARBITRARY)
    elif num_partials > 1:
        dim_sem = ("parallel", "arbitrary")
    else:
        dim_sem = ("arbitrary", "arbitrary")

    partials = pl.pallas_call(
        kernel,
        out_shape=jax.ShapeDtypeStruct((num_partials, acc_rows, _LANES),
                                       jnp.float32),
        grid_spec=pltpu.PrefetchScalarGridSpec(
            num_scalar_prefetch=0,
            grid=(num_partials, bpp),
            in_specs=[
                pl.BlockSpec((tile, _LANES), in_map),
                pl.BlockSpec((tile, _LANES), in_map),
            ],
            out_specs=pl.BlockSpec((1, acc_rows, _LANES),
                                   lambda c, i: (c, 0, 0)),
            scratch_shapes=[pltpu.VMEM((acc_rows, _LANES), jnp.float32)],
        ),
        compiler_params=pltpu.CompilerParams(
            dimension_semantics=dim_sem,
            vmem_limit_bytes=vmem_limit,
        ),
        cost_estimate=cost,
    )(p2d, t2d)

    return (jnp.sum(partials) + tail_sum) / jnp.float32(total_elems)


if __name__ == "__main__":
    key = jax.random.PRNGKey(0)
    k1, k2 = jax.random.split(key)

    # NCHW inputs, as the PyTorch module would receive them.
    pred = jax.random.normal(k1, (2, 4, 16, 16), dtype=jnp.float32)
    target = jax.random.normal(k2, (2, 4, 16, 16), dtype=jnp.float32)

    loss = jax.jit(sigmoid_mae_loss)(pred, target)
    loss = jax.block_until_ready(loss)

    # sanity check against plain-JAX reference
    ref = jnp.mean((pred - target) ** 2)
    assert jnp.allclose(loss, ref, rtol=1e-5, atol=1e-6), (loss, ref)

    print("KERNEL_OK")
</pallas_src>

<mosaic_0001>
module attributes {stable_mosaic.version = 11 : i64} {
  func.func @_mse_partial_kernel(%arg0: i32, %arg1: i32, %arg2: memref<16x128xf32, #tpu.memory_space<vmem>>, %arg3: memref<16x128xf32, #tpu.memory_space<vmem>>, %arg4: memref<1x16x128xf32, #tpu.memory_space<vmem>>, %arg5: memref<16x128xf32, #tpu.memory_space<vmem>>) attributes {dimension_semantics = [#tpu.dimension_semantics<arbitrary>, #tpu.dimension_semantics<arbitrary>], iteration_bounds = array<i64: 1, 1>, scalar_prefetch = 0 : i64, scratch_operands = 1 : i64, tpu.core_type = #tpu.core_type<tc>, window_params = [{transform_indices = @transform_0, window_bounds = array<i64: 16, 128>}, {transform_indices = @transform_1, window_bounds = array<i64: 16, 128>}, {transform_indices = @transform_2, window_bounds = array<i64: 1, 16, 128>}]} {
    %c0_i32 = arith.constant 0 : i32
    %0 = arith.cmpi eq, %arg1, %c0_i32 : i32
    %1 = arith.extui %0 : i1 to i32
    %c0_i32_0 = arith.constant 0 : i32
    %2 = arith.cmpi ne, %1, %c0_i32_0 : i32
    scf.if %2 {
      %cst_10 = arith.constant 0.000000e+00 : f32
      %15 = vector.broadcast %cst_10 : f32 to vector<16x128xf32>
      %c0_11 = arith.constant 0 : index
      %c0_12 = arith.constant 0 : index
      %16 = vector.load %arg5[%c0_11, %c0_12] : memref<16x128xf32, #tpu.memory_space<vmem>>, vector<16x128xf32>
      tpu.vector_store %arg5[%c0_11, %c0_12], %15 {strides = array<i32>} : memref<16x128xf32, #tpu.memory_space<vmem>>, vector<16x128xf32>,
    } else {
    }
    %c0 = arith.constant 0 : index
    %c0_1 = arith.constant 0 : index
    %3 = vector.load %arg2[%c0, %c0_1] : memref<16x128xf32, #tpu.memory_space<vmem>>, vector<16x128xf32>
    %c0_2 = arith.constant 0 : index
    %c0_3 = arith.constant 0 : index
    %4 = vector.load %arg3[%c0_2, %c0_3] : memref<16x128xf32, #tpu.memory_space<vmem>>, vector<16x128xf32>
    %5 = arith.subf %3, %4 : vector<16x128xf32>
    %6 = arith.mulf %5, %5 : vector<16x128xf32>
    %c0_4 = arith.constant 0 : index
    %c0_5 = arith.constant 0 : index
    %7 = vector.load %arg5[%c0_4, %c0_5] : memref<16x128xf32, #tpu.memory_space<vmem>>, vector<16x128xf32>
    %8 = vector.shape_cast %6 : vector<16x128xf32> to vector<1x16x128xf32>
    %cst = arith.constant dense<0.000000e+00> : vector<16x128xf32>
    %9 = vector.multi_reduction <add>, %8, %cst [0] : vector<1x16x128xf32> to vector<16x128xf32>
    %10 = arith.addf %7, %9 : vector<16x128xf32>
    %c0_6 = arith.constant 0 : index
    %c0_7 = arith.constant 0 : index
    %11 = vector.load %arg5[%c0_6, %c0_7] : memref<16x128xf32, #tpu.memory_space<vmem>>, vector<16x128xf32>
    tpu.vector_store %arg5[%c0_6, %c0_7], %10 {strides = array<i32>} : memref<16x128xf32, #tpu.memory_space<vmem>>, vector<16x128xf32>,
    %c0_i32_8 = arith.constant 0 : i32
    %12 = arith.cmpi eq, %arg1, %c0_i32_8 : i32
    %13 = arith.extui %12 : i1 to i32
    %c0_i32_9 = arith.constant 0 : i32
    %14 = arith.cmpi ne, %13, %c0_i32_9 : i32
    scf.if %14 {
      %c0_10 = arith.constant 0 : index
      %c0_11 = arith.constant 0 : index
      %15 = vector.load %arg5[%c0_10, %c0_11] : memref<16x128xf32, #tpu.memory_space<vmem>>, vector<16x128xf32>
      %c0_12 = arith.constant 0 : index
      %c0_13 = arith.constant 0 : index
      %c0_14 = arith.constant 0 : index
      %16 = vector.load %arg4[%c0_12, %c0_13, %c0_14] : memref<1x16x128xf32, #tpu.memory_space<vmem>>, vector<1x16x128xf32>
      %17 = vector.shape_cast %16 : vector<1x16x128xf32> to vector<16x128xf32>
      %18 = vector.shape_cast %15 : vector<16x128xf32> to vector<1x16x128xf32>
      tpu.vector_store %arg4[%c0_12, %c0_13, %c0_14], %18 {strides = array<i32>} : memref<1x16x128xf32, #tpu.memory_space<vmem>>, vector<1x16x128xf32>,
    } else {
    }
    return
  }
  func.func @transform_0(%arg0: i32, %arg1: i32) -> (i32, i32) {
    %c1_i32 = arith.constant 1 : i32
    %0 = arith.muli %arg0, %c1_i32 : i32
    %1 = arith.addi %0, %arg1 : i32
    %c0_i32 = arith.constant 0 : i32
    %2 = arith.minsi %1, %c0_i32 : i32
    %c0_i32_0 = arith.constant 0 : i32
    %c0_i32_1 = arith.constant 0 : i32
    return %2, %c0_i32_0 : i32, i32
  }
  func.func @transform_1(%arg0: i32, %arg1: i32) -> (i32, i32) {
    %c1_i32 = arith.constant 1 : i32
    %0 = arith.muli %arg0, %c1_i32 : i32
    %1 = arith.addi %0, %arg1 : i32
    %c0_i32 = arith.constant 0 : i32
    %2 = arith.minsi %1, %c0_i32 : i32
    %c0_i32_0 = arith.constant 0 : i32
    %c0_i32_1 = arith.constant 0 : i32
    return %2, %c0_i32_0 : i32, i32
  }
  func.func @transform_2(%arg0: i32, %arg1: i32) -> (i32, i32, i32) {
    %c0_i32 = arith.constant 0 : i32
    %c0_i32_0 = arith.constant 0 : i32
    %c0_i32_1 = arith.constant 0 : i32
    return %arg0, %c0_i32, %c0_i32_0 : i32, i32, i32
  }
}

</mosaic_0001>

<bundles_post_ra>
// kernel: sigmoid_mae_loss.1
= control target key start
LH: loop header
LB: loop body
LE: loop exit
PB: predicated region body
PF: predicated region fallthrough
CT: control target
= control target key end

     0   :  { %s153_s0 = inlined_call_operand.vmem [shape: f32[16,128], index: 0, kind: input, shape index: {}]   ;;  %s154_s1 = inlined_call_operand.vmem [shape: f32[16,128], index: 1, kind: input, shape index: {}]   ;;  %s155_s2 = inlined_call_operand.vmem [shape: f32[1,16,128], index: 2, kind: output, shape index: {}]  }
   0x1   :  { %v81_v0 = vld [vmem:[%s153_s0] sm:$0xff]  ;;  %v82_v2 = vld [vmem:[%s153_s0 + $0x8] sm:$0xff] }
   0x2   :  { %v83_v1 = vld [vmem:[%s154_s1] sm:$0xff]  ;;  %v84_v4 = vld [vmem:[%s154_s1 + $0x8] sm:$0xff] }
   0x3   :  { %v85_v3 = vsub.f32 %v81_v0, %v83_v1  ;;  %v86_v5 = vsub.f32 %v82_v2, %v84_v4 }
   0x5   :  { %v87_v6 = vmul.f32 %v85_v3, %v85_v3  ;;  %v88_v7 = vmul.f32 %v86_v5, %v86_v5 }
   0x7   :  { %102 = vst [vmem:[%s155_s2] sm:$0xff] %v87_v6 }
   0x8   :  { %103 = vst [vmem:[%s155_s2 + $0x8] sm:$0xff] %v88_v7 }

</bundles_post_ra>
